<compile_context>
chip_gen: v7x
topology: tpu7x:2x2x1
jax: 0.10.0
libtpu: 0.0.40
codegen_flags: <defaults>
</compile_context>

<pallas_src>
import functools

import jax
import jax.numpy as jnp
from jax.experimental import pallas as pl
from jax.experimental.pallas import tpu as pltpu


def _round_up(x, m):
    return ((x + m - 1) // m) * m


def _largest_divisor_leq(n, cap):
    cap = max(1, min(n, cap))
    for b in range(cap, 0, -1):
        if n % b == 0:
            return b
    return 1


def bilinear_seq_attn_kernel(q_ref, k_ref, bias_ref, w_ref, attn_ref):
    b, tq, d = q_ref.shape

    # Fused projection: one (B*TQ, D) x (D, D) MXU matmul.  The weight was
    # pre-transposed / pre-scaled in the wrapper (W = W_Q^T @ W_K / sqrt(d_k)),
    # so there is no transpose or scale inside the kernel.
    qw = jnp.dot(
        q_ref[...].reshape(b * tq, d), w_ref[...],
        preferred_element_type=jnp.float32,
    ).reshape(b, tq, d)

    # Batched 'nt' contraction on the MXU (contraction expressed directly,
    # no materialized k transpose).
    score = jnp.einsum(
        "bqd,bkd->bqk", qw, k_ref[...], preferred_element_type=jnp.float32
    )

    # Additive mask bias: (B, 1, Lk) broadcasts over the query axis.
    score = score + bias_ref[...]

    # Softmax over keys: exp on the EUP; one reciprocal per row, then a
    # broadcast VPU multiply (cheaper than a per-element divide).
    row_max = jnp.max(score, axis=-1, keepdims=True)
    e = jnp.exp(score - row_max)
    inv = 1.0 / jnp.sum(e, axis=-1, keepdims=True)
    attn_ref[...] = (e * inv).astype(attn_ref.dtype)


def bilinear_seq_attn(query, key, mask, w_q, w_k):
    """query: (N, Lq, D), key: (N, Lk, D), mask: (N, Lk) bool (True = masked),
    w_q / w_k: (D, D) weights of the two bias-free nn.Linear layers.
    Returns attn: (N, Lq, Lk) float32."""
    N, Lq, D = query.shape
    Lk = key.shape[1]

    # ---- One-time algebraic fold (plain XLA, outside the kernel) ----
    # q Wq^T (k Wk^T)^T = q (Wq^T Wk) k^T  =>  fold scale into the weight too.
    w_fused = (w_q.T @ w_k) * (1.0 / jnp.sqrt(jnp.float32(D)))
    w_fused = w_fused.astype(jnp.float32)

    # ---- Padding for lane-dense output / sublane-aligned query tiles ----
    Lk_p = max(128, _round_up(Lk, 128))          # output last dim: multiple of 128
    Lq_p8 = max(8, _round_up(Lq, 8))
    if Lq_p8 <= 512:
        TQ = Lq_p8
        Lq_p = Lq_p8
    else:
        TQ = 512
        Lq_p = _round_up(Lq, TQ)

    query_p = jnp.pad(query.astype(jnp.float32),
                      ((0, 0), (0, Lq_p - Lq), (0, 0)))
    key_p = jnp.pad(key.astype(jnp.float32),
                    ((0, 0), (0, Lk_p - Lk), (0, 0)))

    # Additive mask bias (True / padded key -> -inf, matching masked_fill).
    bias = jnp.where(mask, -jnp.inf, 0.0).astype(jnp.float32)[:, None, :]
    bias_p = jnp.pad(bias, ((0, 0), (0, 0), (0, Lk_p - Lk)),
                     constant_values=float("-inf"))

    # ---- Batch several sequences per grid step to fill the MXU ----
    max_b_rows = max(1, 512 // TQ)                              # keep B*TQ <= 512 rows
    max_b_vmem = max(1, (8 << 20) // (TQ * Lk_p * 4))           # <= 8 MiB output block
    B = _largest_divisor_leq(N, min(max_b_rows, max_b_vmem))

    grid = (N // B, Lq_p // TQ)

    out_p = pl.pallas_call(
        bilinear_seq_attn_kernel,
        out_shape=jax.ShapeDtypeStruct((N, Lq_p, Lk_p), jnp.float32),
        grid_spec=pltpu.PrefetchScalarGridSpec(
            num_scalar_prefetch=0,
            grid=grid,
            in_specs=[
                pl.BlockSpec((B, TQ, D), lambda n, t: (n, t, 0)),    # query tile
                pl.BlockSpec((B, Lk_p, D), lambda n, t: (n, 0, 0)),  # keys
                pl.BlockSpec((B, 1, Lk_p), lambda n, t: (n, 0, 0)),  # mask bias
                pl.BlockSpec((D, D), lambda n, t: (0, 0)),           # fused weight
            ],
            out_specs=pl.BlockSpec((B, TQ, Lk_p), lambda n, t: (n, t, 0)),
        ),
        compiler_params=pltpu.CompilerParams(
            dimension_semantics=("parallel", "parallel"),
            vmem_limit_bytes=48 * 1024 * 1024,
        ),
    )(query_p, key_p, bias_p, w_fused)

    return out_p[:, :Lq, :Lk]


def _reference(query, key, mask, w_q, w_k):
    qp = jnp.einsum("nqd,ed->nqe", query, w_q)
    kp = jnp.einsum("nkd,ed->nke", key, w_k)
    d_k = query.shape[-1]
    score = jnp.einsum("nqd,nkd->nqk", qp, kp) / jnp.sqrt(jnp.float32(d_k))
    score = jnp.where(mask[:, None, :], -jnp.inf, score)
    return jax.nn.softmax(score, axis=-1)


if __name__ == "__main__":
    # Small deterministic example consistent with the module's forward.
    N, Lq, Lk, D = 2, 8, 8, 32   # d_model = 32 (scaled down from 768)

    key0 = jax.random.PRNGKey(0)
    k_q, k_k, k_wq, k_wk = jax.random.split(key0, 4)

    query = jax.random.normal(k_q, (N, Lq, D), dtype=jnp.float32)
    keyt = jax.random.normal(k_k, (N, Lk, D), dtype=jnp.float32)

    # Deterministic parameter init for the two bias-free Linear layers (D, D).
    bound = 1.0 / jnp.sqrt(jnp.float32(D))
    w_q = jax.random.uniform(k_wq, (D, D), jnp.float32, -bound, bound)
    w_k = jax.random.uniform(k_wk, (D, D), jnp.float32, -bound, bound)

    # Boolean mask (True = masked); keep at least one valid key per batch row.
    valid_lens = jnp.array([Lk, 5])
    mask = jnp.arange(Lk)[None, :] >= valid_lens[:, None]   # (N, Lk)

    attn = bilinear_seq_attn(query, keyt, mask, w_q, w_k)
    attn = jax.block_until_ready(attn)

    ref = _reference(query, keyt, mask, w_q, w_k)
    assert attn.shape == (N, Lq, Lk)
    assert jnp.allclose(attn, ref, atol=1e-5, rtol=1e-5), "mismatch vs JAX reference"

    print("KERNEL_OK")
</pallas_src>

<mosaic_0001>
module attributes {stable_mosaic.version = 11 : i64} {
  func.func @bilinear_seq_attn_kernel(%arg0: i32, %arg1: i32, %arg2: memref<2x8x32xf32, #tpu.memory_space<vmem>>, %arg3: memref<2x128x32xf32, #tpu.memory_space<vmem>>, %arg4: memref<2x1x128xf32, #tpu.memory_space<vmem>>, %arg5: memref<32x32xf32, #tpu.memory_space<vmem>>, %arg6: memref<2x8x128xf32, #tpu.memory_space<vmem>>) attributes {dimension_semantics = [#tpu.dimension_semantics<parallel>, #tpu.dimension_semantics<parallel>], iteration_bounds = array<i64: 1, 1>, scalar_prefetch = 0 : i64, scratch_operands = 0 : i64, tpu.core_type = #tpu.core_type<tc>, window_params = [{transform_indices = @transform_0, window_bounds = array<i64: 2, 8, 32>}, {transform_indices = @transform_1, window_bounds = array<i64: 2, 128, 32>}, {transform_indices = @transform_2, window_bounds = array<i64: 2, 1, 128>}, {pipeline_mode = #tpu.pipeline_mode<synchronous>, transform_indices = @transform_3, window_bounds = array<i64: 32, 32>}, {transform_indices = @transform_4, window_bounds = array<i64: 2, 8, 128>}]} {
    %c0 = arith.constant 0 : index
    %c0_0 = arith.constant 0 : index
    %c0_1 = arith.constant 0 : index
    %0 = vector.load %arg2[%c0, %c0_0, %c0_1] : memref<2x8x32xf32, #tpu.memory_space<vmem>>, vector<2x8x32xf32>
    %1 = vector.shape_cast %0 : vector<2x8x32xf32> to vector<16x32xf32>
    %c0_2 = arith.constant 0 : index
    %c0_3 = arith.constant 0 : index
    %2 = vector.load %arg5[%c0_2, %c0_3] : memref<32x32xf32, #tpu.memory_space<vmem>>, vector<32x32xf32>
    %cst = arith.constant dense<0.000000e+00> : vector<16x32xf32>
    %3 = tpu.matmul %1, %2, %cst {dimension_numbers = #tpu.dot_dimension_numbers<[1], [0], [0], [1], [0, 0, 1, 1], [], []>} : vector<16x32xf32>, vector<32x32xf32>, vector<16x32xf32> -> vector<16x32xf32>
    %4 = vector.shape_cast %3 : vector<16x32xf32> to vector<2x8x32xf32>
    %c0_4 = arith.constant 0 : index
    %c0_5 = arith.constant 0 : index
    %c0_6 = arith.constant 0 : index
    %5 = vector.load %arg3[%c0_4, %c0_5, %c0_6] : memref<2x128x32xf32, #tpu.memory_space<vmem>>, vector<2x128x32xf32>
    "tpu.trace_start"() <{level = 10 : i32, message = "bqd,bkd->bqk"}> : () -> ()
    %cst_7 = arith.constant dense<0.000000e+00> : vector<2x8x128xf32>
    %6 = tpu.matmul %4, %5, %cst_7 {dimension_numbers = #tpu.dot_dimension_numbers<[2], [2], [1], [1], [0, 0, 0, 1, 1, 1], [0], [0]>} : vector<2x8x32xf32>, vector<2x128x32xf32>, vector<2x8x128xf32> -> vector<2x8x128xf32>
    "tpu.trace_stop"() : () -> ()
    %c0_8 = arith.constant 0 : index
    %c0_9 = arith.constant 0 : index
    %c0_10 = arith.constant 0 : index
    %7 = vector.load %arg4[%c0_8, %c0_9, %c0_10] : memref<2x1x128xf32, #tpu.memory_space<vmem>>, vector<2x1x128xf32>
    %8 = vector.broadcast %7 : vector<2x1x128xf32> to vector<2x8x128xf32>
    %9 = arith.addf %6, %8 : vector<2x8x128xf32>
    %cst_11 = arith.constant dense<0xFF800000> : vector<2x8xf32>
    %10 = vector.multi_reduction <maximumf>, %9, %cst_11 [2] : vector<2x8x128xf32> to vector<2x8xf32>
    %11 = vector.shape_cast %10 : vector<2x8xf32> to vector<2x8x1xf32>
    %12 = vector.broadcast %11 : vector<2x8x1xf32> to vector<2x8x128xf32>
    %13 = arith.subf %9, %12 : vector<2x8x128xf32>
    %14 = math.exp %13 : vector<2x8x128xf32>
    %cst_12 = arith.constant dense<0.000000e+00> : vector<2x8xf32>
    %15 = vector.multi_reduction <add>, %14, %cst_12 [2] : vector<2x8x128xf32> to vector<2x8xf32>
    %16 = vector.shape_cast %15 : vector<2x8xf32> to vector<2x8x1xf32>
    %cst_13 = arith.constant 1.000000e+00 : f32
    %17 = vector.broadcast %cst_13 : f32 to vector<2x8x1xf32>
    %18 = arith.divf %17, %16 : vector<2x8x1xf32>
    %19 = vector.broadcast %18 : vector<2x8x1xf32> to vector<2x8x128xf32>
    %20 = arith.mulf %14, %19 : vector<2x8x128xf32>
    %c0_14 = arith.constant 0 : index
    %c0_15 = arith.constant 0 : index
    %c0_16 = arith.constant 0 : index
    %21 = vector.load %arg6[%c0_14, %c0_15, %c0_16] : memref<2x8x128xf32, #tpu.memory_space<vmem>>, vector<2x8x128xf32>
    tpu.vector_store %arg6[%c0_14, %c0_15, %c0_16], %20 {strides = array<i32>} : memref<2x8x128xf32, #tpu.memory_space<vmem>>, vector<2x8x128xf32>,
    return
  }
  func.func @transform_0(%arg0: i32, %arg1: i32) -> (i32, i32, i32) {
    %c0_i32 = arith.constant 0 : i32
    %c0_i32_0 = arith.constant 0 : i32
    return %arg0, %arg1, %c0_i32 : i32, i32, i32
  }
  func.func @transform_1(%arg0: i32, %arg1: i32) -> (i32, i32, i32) {
    %c0_i32 = arith.constant 0 : i32
    %c0_i32_0 = arith.constant 0 : i32
    %c0_i32_1 = arith.constant 0 : i32
    return %arg0, %c0_i32, %c0_i32_0 : i32, i32, i32
  }
  func.func @transform_2(%arg0: i32, %arg1: i32) -> (i32, i32, i32) {
    %c0_i32 = arith.constant 0 : i32
    %c0_i32_0 = arith.constant 0 : i32
    %c0_i32_1 = arith.constant 0 : i32
    return %arg0, %c0_i32, %c0_i32_0 : i32, i32, i32
  }
  func.func @transform_3(%arg0: i32, %arg1: i32) -> (i32, i32) {
    %c0_i32 = arith.constant 0 : i32
    %c0_i32_0 = arith.constant 0 : i32
    %c0_i32_1 = arith.constant 0 : i32
    return %c0_i32, %c0_i32_0 : i32, i32
  }
  func.func @transform_4(%arg0: i32, %arg1: i32) -> (i32, i32, i32) {
    %c0_i32 = arith.constant 0 : i32
    %c0_i32_0 = arith.constant 0 : i32
    return %arg0, %arg1, %c0_i32 : i32, i32, i32
  }
}

</mosaic_0001>

<bundles_post_ra>
// kernel: tpu_custom_call.1
= control target key start
LH: loop header
LB: loop body
LE: loop exit
PB: predicated region body
PF: predicated region fallthrough
CT: control target
= control target key end

     0   :  { %vm24_vm0 = vcmask 261120   ;;  %v701_v6 = vmov 0.0|0.0   ;;  %s922_s0 = inlined_call_operand.vmem [shape: f32[2,8,32], index: 0, kind: input, shape index: {}]   ;;  %s923_s1 = inlined_call_operand.vmem [shape: f32[2,128,32], index: 1, kind: input, shape index: {}]   ;;  %s924_s2 = inlined_call_operand.vmem [shape: f32[2,1,128], index: 2, kind: input, shape index: {}]   ;;  %s925_s3 = inlined_call_operand.vmem [shape: f32[32,32], index: 3, kind: input, shape index: {}]   ;;  %s926_s4 = inlined_call_operand.hbm [shape: f32[2,8,128], index: 4, kind: output, shape index: {}]  }
   0x1   :  { %v20_v0 = vld [vmem:[%s925_s3] sm:$0xff]  ;;  %v21_v1 = vld [vmem:[%s925_s3 + $0x8] sm:$0xff]  ;;  %v22_v2 = vld [vmem:[%s925_s3 + $0x10] sm:$0xff]  ;;  %599 = vmatprep.subr.bf16.mxu1 %v701_v6 }
   0x2   :  { %v591_v3 = vpack.c.bf16 %v21_v1, %v20_v0  ;;  %v23_v4 = vld [vmem:[%s925_s3 + $0x18] sm:$0xff]  ;;  %v18_v5 = vld [vmem:[%s922_s0] sm:$0xff]  ;;  %vm751_vm1 = vmpackc.low %vm24_vm0, %vm24_vm0 }
   0x3   :  { %v595_v7 = vpack.c.bf16 %v23_v4, %v22_v2  ;;  %518 = vmatprep.mubr.msk.f32.mxu0 %vm24_vm0, %v18_v5  ;;  %v106_v9 = vld [vmem:[%s923_s1] sm:$0xff]  ;;  %v107_v10 = vld [vmem:[%s923_s1 + $0x8] sm:$0xff]  ;;  %v108_v12 = vld [vmem:[%s923_s1 + $0x10] sm:$0xff] }
   0x4   :  { %592 = vmatprep.subr.bf16.mxu0 %v591_v3  ;;  %v600_v11 = vpack.c.bf16 %v107_v10, %v106_v9  ;;  %v109_v13 = vld [vmem:[%s923_s1 + $0x18] sm:$0xff]  ;;  %v19_v14 = vld [vmem:[%s922_s0 + $0x8] sm:$0xff]  ;;  %v122_v15 = vld [vmem:[%s923_s1 + $0x80] sm:$0xff] }
   0x5   :  { %594 = vmatpush3.bf16.msra.mxu0 %v591_v3  ;;  %v123_v16 = vld [vmem:[%s923_s1 + $0x88] sm:$0xff]  ;;  %v604_v17 = vpack.c.bf16 %v109_v13, %v108_v12 }
   0x6   :  { %596 = vmatprep.subr.bf16.mxu0 %v595_v7  ;;  %602 = vmatpush3.bf16.xpose.msk.msra.mxu1 %vm751_vm1, %v600_v11  ;;  %v632_v18 = vpack.c.bf16 %v123_v16, %v122_v15 }
   0x7   :  { %603 = vmatprep.subr.bf16.mxu1 %v701_v6 }
   0x9   :  { %598 = vmatpush3.bf16.msra.mxu0 %v595_v7 }
   0xa   :  { %631 = vmatprep.subr.bf16.mxu0 %v701_v6 }
   0xc   :  { %519 = vmatmul.mubr.msk.f32.vlgmr.msra.gmra.mrb[0].mxu0 %vm24_vm0, %v19_v14 }
   0xd   :  { %9 = vsyncpa [#allocation3], 0  ;;  %v110_v19 = vld [vmem:[%s923_s1 + $0x20] sm:$0xff]  ;;  %v111_v20 = vld [vmem:[%s923_s1 + $0x28] sm:$0xff]  ;;  %vm702_vm2 = vmmov 0   ;;  %v703_v58 = vmov 0.0  }
   0xe   :  { %606 = vmatpush3.bf16.xpose.msk.msra.mxu1 %vm751_vm1, %v604_v17  ;;  %v124_v21 = vld [vmem:[%s923_s1 + $0x90] sm:$0xff]  ;;  %v125_v22 = vld [vmem:[%s923_s1 + $0x98] sm:$0xff]  ;;  %v608_v23 = vpack.c.bf16 %v111_v20, %v110_v19  ;;  %v126_v27 = vld [vmem:[%s923_s1 + $0xa0] sm:$0xff]  ;;  %588 = vmatprep.mubr.msk.f32.mxu0 %vm702_vm2, %v703_v58 }
   0xf   :  { %607 = vmatprep.subr.bf16.mxu1 %v701_v6  ;;  %v636_v24 = vpack.c.bf16 %v125_v22, %v124_v21  ;;  %v112_v25 = vld [vmem:[%s923_s1 + $0x30] sm:$0xff]  ;;  %v113_v26 = vld [vmem:[%s923_s1 + $0x38] sm:$0xff]  ;;  %v127_v28 = vld [vmem:[%s923_s1 + $0xa8] sm:$0xff]  ;;  %553 = vmatprep.mubr.msk.f32.mxu1 %vm702_vm2, %v703_v58 }
  0x10   :  { %v612_v29 = vpack.c.bf16 %v113_v26, %v112_v25  ;;  %v640_v30 = vpack.c.bf16 %v127_v28, %v126_v27  ;;  %v114_v31 = vld [vmem:[%s923_s1 + $0x40] sm:$0xff]  ;;  %v115_v32 = vld [vmem:[%s923_s1 + $0x48] sm:$0xff]  ;;  %v128_v33 = vld [vmem:[%s923_s1 + $0xb0] sm:$0xff] }
  0x11   :  { %v129_v34 = vld [vmem:[%s923_s1 + $0xb8] sm:$0xff]  ;;  %v616_v35 = vpack.c.bf16 %v115_v32, %v114_v31  ;;  %v116_v37 = vld [vmem:[%s923_s1 + $0x50] sm:$0xff]  ;;  %v130_v39 = vld [vmem:[%s923_s1 + $0xc0] sm:$0xff] }
  0x12   :  { %634 = vmatpush3.bf16.xpose.msk.msra.mxu0 %vm751_vm1, %v632_v18  ;;  %v644_v36 = vpack.c.bf16 %v129_v34, %v128_v33  ;;  %v117_v38 = vld [vmem:[%s923_s1 + $0x58] sm:$0xff]  ;;  %v131_v40 = vld [vmem:[%s923_s1 + $0xc8] sm:$0xff]  ;;  %v118_v43 = vld [vmem:[%s923_s1 + $0x60] sm:$0xff] }
  0x13   :  { %635 = vmatprep.subr.bf16.mxu0 %v701_v6  ;;  %v620_v41 = vpack.c.bf16 %v117_v38, %v116_v37  ;;  %v648_v42 = vpack.c.bf16 %v131_v40, %v130_v39  ;;  %v119_v44 = vld [vmem:[%s923_s1 + $0x68] sm:$0xff]  ;;  %v132_v45 = vld [vmem:[%s923_s1 + $0xd0] sm:$0xff]  ;;  %v133_v46 = vld [vmem:[%s923_s1 + $0xd8] sm:$0xff] }
  0x14   :  { %v624_v47 = vpack.c.bf16 %v119_v44, %v118_v43  ;;  %v652_v48 = vpack.c.bf16 %v133_v46, %v132_v45  ;;  %v120_v49 = vld [vmem:[%s923_s1 + $0x70] sm:$0xff]  ;;  %v121_v50 = vld [vmem:[%s923_s1 + $0x78] sm:$0xff]  ;;  %v134_v51 = vld [vmem:[%s923_s1 + $0xe0] sm:$0xff] }
  0x15   :  { %v135_v52 = vld [vmem:[%s923_s1 + $0xe8] sm:$0xff]  ;;  %v628_v53 = vpack.c.bf16 %v121_v50, %v120_v49  ;;  %v136_v55 = vld [vmem:[%s923_s1 + $0xf0] sm:$0xff]  ;;  %v137_v56 = vld [vmem:[%s923_s1 + $0xf8] sm:$0xff] }
  0x16   :  { %610 = vmatpush3.bf16.xpose.msk.msra.mxu1 %vm751_vm1, %v608_v23  ;;  %v656_v54 = vpack.c.bf16 %v135_v52, %v134_v51  ;;  %v660_v57 = vpack.c.bf16 %v137_v56, %v136_v55  ;;  %v434_v61 = vld [vmem:[%s924_s2] ss:$0 sm:$0xff]  ;;  %v435_v3 = vld [vmem:[%s924_s2 + $0x1] ss:$0 sm:$0xff]  ;;  %s704_s2 = smov [#allocation2]  }
  0x17   :  { %611 = vmatprep.subr.bf16.mxu1 %v701_v6  ;;  %s421_s11 = sshll.u32 %s704_s2, 4  ;;  %s422_s11 = int_to_ptr.vmem [resolvable:$true] %s421_s11 }
  0x18   :  { %s677_s0 = scalar_lea.vmem %s422_s11, 256  ;;  %p682_p1 = scmp.lt.s32.totalorder %s422_s11, %s422_s11 }
  0x19   :  { %p678_p0 = scmp.ne.s32.totalorder %s422_s11, %s677_s0  ;;  %p683_p2 = scmp.lt.s32.totalorder %s677_s0, %s677_s0 }
  0x1a   :  { %638 = vmatpush3.bf16.xpose.msk.msra.mxu0 %vm751_vm1, %v636_v24 }
  0x1b   :  { %639 = vmatprep.subr.bf16.mxu0 %v701_v6  ;;  %p684_p3 = por %p683_p2, %p682_p1 }
  0x1d   :  { %p685_p4 = pnand %p684_p3, %p678_p0 }
  0x1e   :  { %614 = vmatpush3.bf16.xpose.msk.msra.mxu1 %vm751_vm1, %v612_v29 }
  0x1f   :  { %615 = vmatprep.subr.bf16.mxu1 %v701_v6 }
  0x22   :  { %642 = vmatpush3.bf16.xpose.msk.msra.mxu0 %vm751_vm1, %v640_v30 }
  0x23   :  { %643 = vmatprep.subr.bf16.mxu0 %v701_v6 }
  0x26   :  { %618 = vmatpush3.bf16.xpose.msk.msra.mxu1 %vm751_vm1, %v616_v35 }
  0x27   :  { %619 = vmatprep.subr.bf16.mxu1 %v701_v6 }
  0x2a   :  { %646 = vmatpush3.bf16.xpose.msk.msra.mxu0 %vm751_vm1, %v644_v36 }
  0x2b   :  { %647 = vmatprep.subr.bf16.mxu0 %v701_v6 }
  0x2e   :  { %622 = vmatpush3.bf16.xpose.msk.msra.mxu1 %vm751_vm1, %v620_v41 }
  0x2f   :  { %623 = vmatprep.subr.bf16.mxu1 %v701_v6 }
  0x32   :  { %650 = vmatpush3.bf16.xpose.msk.msra.mxu0 %vm751_vm1, %v648_v42 }
  0x33   :  { %651 = vmatprep.subr.bf16.mxu0 %v701_v6 }
  0x36   :  { %626 = vmatpush3.bf16.xpose.msk.msra.mxu1 %vm751_vm1, %v624_v47 }
  0x37   :  { %627 = vmatprep.subr.bf16.mxu1 %v701_v6 }
  0x3a   :  { %654 = vmatpush3.bf16.xpose.msk.msra.mxu0 %vm751_vm1, %v652_v48 }
  0x3b   :  { %655 = vmatprep.subr.bf16.mxu0 %v701_v6 }
  0x3e   :  { %630 = vmatpush3.bf16.xpose.msk.msra.mxu1 %vm751_vm1, %v628_v53 }
  0x42   :  { %658 = vmatpush3.bf16.xpose.msk.msra.mxu0 %vm751_vm1, %v656_v54 }
  0x43   :  { %659 = vmatprep.subr.bf16.mxu0 %v701_v6 }
  0x4a   :  { %662 = vmatpush3.bf16.xpose.msk.msra.mxu0 %vm751_vm1, %v660_v57 }
  0xdf   :  { %v520_v59 = vpop.f32.mrb[0].mxu0 }
  0xe0   :  { %v97_v60 = vpop.f32.mrb[1].mxu0  ;;  %589 = vmatmul.mubr.msk.f32.vlgmr.msra.gmra.mrb[2].mxu0 %vm24_vm0, %v520_v59 }
  0xe1   :  { %554 = vmatmul.mubr.msk.f32.vlgmr.msra.gmra.mrb[0].mxu1 %vm24_vm0, %v97_v60 }
 0x1b3   :  { %v390_v62 = vpop.f32.mrb[2].mxu0 }
 0x1b4   :  { %v269_v63 = vpop.f32.mrb[0].mxu1  ;;  %v590_v0 = vpop.f32.mrb[3].mxu0  ;;  %v391_v4 = vadd.f32 %v435_v3, %v390_v62 }
 0x1b5   :  { %v270_v1 = vadd.f32 %v434_v61, %v269_v63  ;;  %v555_v2 = vpop.f32.mrb[1].mxu1 }
 0x1b7   :  { %394 = vmax.xlane.f32.xlu0 %v270_v1 }
 0x1bb   :  { %396 = vmax.xlane.f32.xlu0 %v391_v4 }
 0x244   :  { %v395_v5 = vpop.xlane.xlu0 %394 }
 0x245   :  { %v398_v6 = vsub.f32 %v270_v1, %v395_v5 }
 0x247   :  { %v400_v7 = vmul.f32 1.442695, %v398_v6 }
 0x248   :  { %v397_v8 = vpop.xlane.xlu0 %396 }
 0x249   :  { %669 = vpow2.f32 %v400_v7  ;;  %v399_v9 = vsub.f32 %v391_v4, %v397_v8 }
 0x24b   :  { %v402_v10 = vmul.f32 1.442695, %v399_v9 }
 0x24d   :  { %671 = vpow2.f32 %v402_v10 }
 0x253   :  { %v670_v11 = vpop.eup %669 }
 0x254   :  { %404 = vadd.xlane.f32.xlu1 %v670_v11 }
 0x257   :  { %v672_v12 = vpop.eup %671 }
 0x258   :  { %406 = vadd.xlane.f32.xlu1 %v672_v12 }
 0x2e1   :  { %v405_v13 = vpop.xlane.xlu1 %404 }
 0x2e2   :  { %673 = vrcp.f32 %v405_v13 }
 0x2e5   :  { %v407_v14 = vpop.xlane.xlu1 %406 }
 0x2e6   :  { %675 = vrcp.f32 %v407_v14 }
 0x2ec   :  { %v674_v15 = vpop.eup %673 }
 0x2ed   :  { %v412_v16 = vmul.f32 %v674_v15, %v670_v11 }
 0x2ef   :  { %414 = vst [vmem:[#allocation2] sm:$0xff] %v412_v16 }
 0x2f0   :  { %v676_v17 = vpop.eup %675 }
 0x2f1   :  { %v413_v18 = vmul.f32 %v676_v17, %v672_v12 }
 0x2f3   :  { %415 = vst [vmem:[#allocation2 + $0x8] sm:$0xff] %v413_v18 }
 0x2f4   :  { %688 = shalt.err (!%p685_p4)
}
 0x2f5   :  { %s689_s14 = scalar_lea.hbm %s926_s4, 256 }
 0x2f6   :  { %p690_p5 = scmp.ne.s32.totalorder %s926_s4, %s689_s14  ;;  %p693_p6 = scmp.lt.u32.totalorder %s689_s14, %s926_s4 }
 0x2f8   :  { %p695_p7 = pnand %p693_p6, %p690_p5 }
 0x2fa   :  { %698 = shalt.err (!%p695_p7)
}
 0x2fb   :  { %s705_s19 = smov 128   ;;  %s706_s20 = smov 8  }
 0x2fc   :  { %427 = dma.vmem_to_hbm [thread:$0]  %s422_s11, 256, %s926_s4, [#allocation3], %s705_s19, %s705_s19, %s706_s20  }
 0x2fd   :  { %699 = dma.done.wait [#allocation3], 256  }
 0x2fe   :  { %700 = vsyncadd [#allocation3], 4294967040 }
 0x2ff   :  { %431 = vsyncpa [#allocation3], 1 }

</bundles_post_ra>
